<compile_context>
chip_gen: v7x
topology: tpu7x:2x2x1
jax: 0.10.0
libtpu: 0.0.40
codegen_flags: <defaults>
</compile_context>

<pallas_src>
import functools
import math

import jax
import jax.numpy as jnp
from jax import lax
from jax.experimental import pallas as pl
from jax.experimental.pallas import tpu as pltpu

_LANES = 128
_SUBLANES = 8


def _round_up(x, m):
    return ((x + m - 1) // m) * m


def _mse_partial_kernel(d_ref, y_ref, o_ref, *, block_rows, chunk_rows,
                        inner, n_blocks, last_valid, needs_mask, padded,
                        unroll):
    """Accumulate sum((d-y)^2) of this row-block into a resident (8,128) block."""
    c = pl.program_id(0)          # "parallel" axis: per-TensorCore partial sum
    i = pl.program_id(1)          # "arbitrary" axis: sequential reduction
    g = c * inner + i             # global row-block id

    @pl.when(i == 0)
    def _():
        o_ref[...] = jnp.zeros_like(o_ref)

    n_chunks = block_rows // chunk_rows

    def accumulate(valid_rows):
        # valid_rows is a *static* Python int (or None): the masked and
        # unmasked paths are traced separately, so the common path carries no
        # mask VALU work.
        def body(j, acc):
            start = pl.multiple_of(j * chunk_rows, chunk_rows)
            dc = d_ref[pl.ds(start, chunk_rows), :].astype(jnp.float32)
            yc = y_ref[pl.ds(start, chunk_rows), :].astype(jnp.float32)
            diff = dc - yc
            if valid_rows is not None:
                row_ids = start + lax.broadcasted_iota(
                    jnp.int32, (chunk_rows, _LANES), 0)
                # Zero garbage rows *before* squaring so NaN/Inf padding
                # never leaks into the sum.
                diff = jnp.where(row_ids < valid_rows, diff, 0.0)
            sq = diff * diff
            # Pure VPU: fold the chunk onto one (8,128) vreg tile.
            return acc + jnp.sum(
                sq.reshape(chunk_rows // _SUBLANES, _SUBLANES, _LANES), axis=0)

        acc = lax.fori_loop(0, n_chunks, body,
                            jnp.zeros((_SUBLANES, _LANES), jnp.float32),
                            unroll=unroll)
        o_ref[...] += acc

    last = n_blocks - 1
    if needs_mask:
        # Fast path for all full blocks; masked path only for the last real
        # block.  Padded duplicate blocks (g > last) fall through both whens.
        @pl.when(g < last)
        def _():
            accumulate(None)

        @pl.when(g == last)
        def _():
            accumulate(last_valid)
    else:
        if padded:
            @pl.when(g <= last)
            def _():
                accumulate(None)
        else:
            accumulate(None)


def mse_control(d, y, *, row_tile=8192):
    """sum((d - y)**2) / d.shape[0], computed with a Pallas TPU kernel."""
    assert d.shape == y.shape, "d and y must have the same shape"
    batch = d.shape[0]
    total = math.prod(d.shape)

    d_flat = d.reshape(-1)
    y_flat = y.reshape(-1)

    # Kernel covers every full 128-lane row; for typical tensors
    # (total % 128 == 0) that is the entire input -> no sliced/copied operand.
    rows_k = total // _LANES
    main = rows_k * _LANES

    if main < total:
        # < 128 trailing elements: plain JAX, negligible HBM traffic.
        dt = d_flat[main:].astype(jnp.float32)
        yt = y_flat[main:].astype(jnp.float32)
        tail = jnp.sum((dt - yt) * (dt - yt))
    else:
        tail = jnp.float32(0.0)

    if rows_k < _SUBLANES:
        # Tiny input (< 1024 elements): not worth a kernel launch.
        df = d_flat[:main].astype(jnp.float32)
        yf = y_flat[:main].astype(jnp.float32)
        return (jnp.sum((df - yf) * (df - yf)) + tail) / batch

    if main == total:
        d_main = d_flat.reshape(rows_k, _LANES)     # free reshape, no HBM copy
        y_main = y_flat.reshape(rows_k, _LANES)
    else:
        # Rare ragged case (total % 128 != 0); allow_input_fusion below lets
        # XLA fuse this slice into the custom call instead of copying.
        d_main = d_flat[:main].reshape(rows_k, _LANES)
        y_main = y_flat[:main].reshape(rows_k, _LANES)

    itemsize = max(d_main.dtype.itemsize, y_main.dtype.itemsize)
    if itemsize > 4:
        row_tile = max(_LANES, row_tile // 2)       # keep VMEM budget fixed

    # ---- Block / grid geometry -------------------------------------------
    rows8 = (rows_k // _SUBLANES) * _SUBLANES       # multiple of 8, >= 8
    block_rows = min(row_tile, rows8)               # never exceeds the array
    n_blocks = pl.cdiv(rows_k, block_rows)

    # Prefer an even block count so the 2-way TensorCore split needs no
    # padded duplicate block.
    if n_blocks >= 2 and n_blocks % 2 == 1:
        cand = min(row_tile,
                   _round_up(pl.cdiv(rows_k, n_blocks + 1), _SUBLANES))
        if cand >= _SUBLANES and pl.cdiv(rows_k, cand) % 2 == 0:
            block_rows = cand
            n_blocks = pl.cdiv(rows_k, block_rows)

    num_splits = 2 if n_blocks >= 2 else 1
    inner = pl.cdiv(n_blocks, num_splits)
    padded = num_splits * inner > n_blocks
    needs_mask = (rows_k % block_rows) != 0
    last_valid = rows_k - (n_blocks - 1) * block_rows

    # Chunk: largest multiple of 8 dividing block_rows, capped at 128 rows,
    # so each fori step touches <= 16 vregs per operand (no VMEM temporaries).
    chunk_rows = _SUBLANES * math.gcd(block_rows // _SUBLANES, 16)
    unroll = max(1, min(block_rows // chunk_rows, 8))

    kernel = functools.partial(
        _mse_partial_kernel,
        block_rows=block_rows, chunk_rows=chunk_rows, inner=inner,
        n_blocks=n_blocks, last_valid=last_valid, needs_mask=needs_mask,
        padded=padded, unroll=unroll)

    if padded:
        in_map = lambda c, i: (jnp.minimum(c * inner + i, n_blocks - 1), 0)
    else:
        in_map = lambda c, i: (c * inner + i, 0)

    cost = pl.CostEstimate(
        flops=3 * main,
        transcendentals=0,
        bytes_accessed=main * (d_main.dtype.itemsize + y_main.dtype.itemsize)
        + num_splits * _SUBLANES * _LANES * 4)

    out = pl.pallas_call(
        kernel,
        out_shape=jax.ShapeDtypeStruct((num_splits * _SUBLANES, _LANES),
                                       jnp.float32),
        grid_spec=pltpu.PrefetchScalarGridSpec(
            num_scalar_prefetch=0,
            grid=(num_splits, inner),
            in_specs=[
                pl.BlockSpec((block_rows, _LANES), in_map),
                pl.BlockSpec((block_rows, _LANES), in_map),
            ],
            out_specs=pl.BlockSpec((_SUBLANES, _LANES), lambda c, i: (c, 0)),
        ),
        compiler_params=pltpu.CompilerParams(
            # TODO(synk): on v7x, verify in xprof that the size-2 "parallel"
            # axis is sharded across both TensorCores; if not, switch it to
            # pltpu.CORE_PARALLEL.
            dimension_semantics=("parallel", "arbitrary"),
            vmem_limit_bytes=32 * 1024 * 1024,
            allow_input_fusion=[True, True],
        ),
        cost_estimate=cost,
    )(d_main, y_main)

    main_sum = jnp.sum(out)                         # tiny final reduce
    return (main_sum + tail) / batch


if __name__ == "__main__":
    key = jax.random.PRNGKey(0)
    k1, k2 = jax.random.split(key)

    # Small NCHW-shaped inputs consistent with a typical use of this loss.
    d = jax.random.normal(k1, (2, 4, 16, 16), dtype=jnp.float32)
    y = jax.random.normal(k2, (2, 4, 16, 16), dtype=jnp.float32)

    result = jax.block_until_ready(mse_control(d, y))

    # Reference check in plain JAX.
    ref = jnp.sum((d - y) * (d - y)) / d.shape[0]
    assert jnp.allclose(result, ref, rtol=1e-5, atol=1e-5), (result, ref)

    print("KERNEL_OK")
</pallas_src>

<mosaic_0001>
module attributes {stable_mosaic.version = 11 : i64} {
  func.func @_mse_partial_kernel(%arg0: i32, %arg1: i32, %arg2: memref<16x128xf32, #tpu.memory_space<vmem>>, %arg3: memref<16x128xf32, #tpu.memory_space<vmem>>, %arg4: memref<8x128xf32, #tpu.memory_space<vmem>>) attributes {dimension_semantics = [#tpu.dimension_semantics<parallel>, #tpu.dimension_semantics<arbitrary>], iteration_bounds = array<i64: 1, 1>, scalar_prefetch = 0 : i64, scratch_operands = 0 : i64, tpu.core_type = #tpu.core_type<tc>, window_params = [{transform_indices = @transform_0, window_bounds = array<i64: 16, 128>}, {transform_indices = @transform_1, window_bounds = array<i64: 16, 128>}, {transform_indices = @transform_2, window_bounds = array<i64: 8, 128>}]} {
    %c0_i32 = arith.constant 0 : i32
    %0 = arith.cmpi eq, %arg1, %c0_i32 : i32
    %1 = arith.extui %0 : i1 to i32
    %c0_i32_0 = arith.constant 0 : i32
    %2 = arith.cmpi ne, %1, %c0_i32_0 : i32
    scf.if %2 {
      %cst_8 = arith.constant 0.000000e+00 : f32
      %18 = vector.broadcast %cst_8 : f32 to vector<8x128xf32>
      %c0_9 = arith.constant 0 : index
      %c0_10 = arith.constant 0 : index
      %19 = vector.load %arg4[%c0_9, %c0_10] : memref<8x128xf32, #tpu.memory_space<vmem>>, vector<8x128xf32>
      tpu.vector_store %arg4[%c0_9, %c0_10], %18 {strides = array<i32>} : memref<8x128xf32, #tpu.memory_space<vmem>>, vector<8x128xf32>,
    } else {
    }
    %cst = arith.constant 0.000000e+00 : f32
    %3 = vector.broadcast %cst : f32 to vector<8x128xf32>
    %c0_i32_1 = arith.constant 0 : i32
    %c16_i32 = arith.constant 16 : i32
    %4 = arith.muli %c0_i32_1, %c16_i32 : i32
    %5 = tpu.assume_multiple %4, 16 : i32
    %6 = arith.index_cast %5 : i32 to index
    %c0 = arith.constant 0 : index
    %7 = vector.load %arg2[%6, %c0] : memref<16x128xf32, #tpu.memory_space<vmem>>, vector<16x128xf32>
    %8 = arith.index_cast %5 : i32 to index
    %c0_2 = arith.constant 0 : index
    %9 = vector.load %arg3[%8, %c0_2] : memref<16x128xf32, #tpu.memory_space<vmem>>, vector<16x128xf32>
    %10 = arith.subf %7, %9 : vector<16x128xf32>
    %11 = arith.mulf %10, %10 : vector<16x128xf32>
    %12 = vector.shape_cast %11 : vector<16x128xf32> to vector<2x8x128xf32>
    %cst_3 = arith.constant dense<0.000000e+00> : vector<8x128xf32>
    %13 = vector.multi_reduction <add>, %12, %cst_3 [0] : vector<2x8x128xf32> to vector<8x128xf32>
    %14 = arith.addf %3, %13 : vector<8x128xf32>
    %c1_i32 = arith.constant 1 : i32
    %c0_4 = arith.constant 0 : index
    %c0_5 = arith.constant 0 : index
    %15 = vector.load %arg4[%c0_4, %c0_5] : memref<8x128xf32, #tpu.memory_space<vmem>>, vector<8x128xf32>
    %16 = arith.addf %15, %14 : vector<8x128xf32>
    %c0_6 = arith.constant 0 : index
    %c0_7 = arith.constant 0 : index
    %17 = vector.load %arg4[%c0_6, %c0_7] : memref<8x128xf32, #tpu.memory_space<vmem>>, vector<8x128xf32>
    tpu.vector_store %arg4[%c0_6, %c0_7], %16 {strides = array<i32>} : memref<8x128xf32, #tpu.memory_space<vmem>>, vector<8x128xf32>,
    return
  }
  func.func @transform_0(%arg0: i32, %arg1: i32) -> (i32, i32) {
    %c1_i32 = arith.constant 1 : i32
    %0 = arith.muli %arg0, %c1_i32 : i32
    %1 = arith.addi %0, %arg1 : i32
    %c0_i32 = arith.constant 0 : i32
    %c0_i32_0 = arith.constant 0 : i32
    return %1, %c0_i32 : i32, i32
  }
  func.func @transform_1(%arg0: i32, %arg1: i32) -> (i32, i32) {
    %c1_i32 = arith.constant 1 : i32
    %0 = arith.muli %arg0, %c1_i32 : i32
    %1 = arith.addi %0, %arg1 : i32
    %c0_i32 = arith.constant 0 : i32
    %c0_i32_0 = arith.constant 0 : i32
    return %1, %c0_i32 : i32, i32
  }
  func.func @transform_2(%arg0: i32, %arg1: i32) -> (i32, i32) {
    %c0_i32 = arith.constant 0 : i32
    %c0_i32_0 = arith.constant 0 : i32
    return %arg0, %c0_i32 : i32, i32
  }
}

</mosaic_0001>

<bundles_post_ra>
// kernel: tpu_custom_call.1
= control target key start
LH: loop header
LB: loop body
LE: loop exit
PB: predicated region body
PF: predicated region fallthrough
CT: control target
= control target key end

     0   :  { %7 = vsyncpa [#allocation3], 0  ;;  %s220_s0 = inlined_call_operand.hbm [shape: f32[16,128], index: 0, kind: input, shape index: {}]   ;;  %s221_s1 = inlined_call_operand.hbm [shape: f32[16,128], index: 1, kind: input, shape index: {}]   ;;  %s222_s2 = inlined_call_operand.hbm [shape: f32[8,128], index: 2, kind: output, shape index: {}]  }
   0x1   :  { %8 = vsyncpa [#allocation6], 0 }
   0x2   :  { %9 = vsyncpa [#allocation4], 0  ;;  %s164_s9 = smov [#allocation2]   ;;  %s92_s13 = scalar_lea.hbm %s220_s0, 256 }
   0x3   :  { %s19_s10 = sshll.u32 %s164_s9, 4  ;;  %p93_p0 = scmp.ne.s32.totalorder %s220_s0, %s92_s13  ;;  %s20_s10 = int_to_ptr.vmem [resolvable:$true] %s19_s10 }
   0x4   :  { %p96_p1 = scmp.lt.u32.totalorder %s92_s13, %s220_s0 }
   0x6   :  { %p98_p2 = pnand %p96_p1, %p93_p0 }
   0x8   :  { %101 = shalt.err (!%p98_p2)
}
   0x9   :  { %s102_s18 = scalar_lea.vmem %s20_s10, 256  ;;  %p107_p4 = scmp.lt.s32.totalorder %s20_s10, %s20_s10 }
   0xa   :  { %p103_p3 = scmp.ne.s32.totalorder %s20_s10, %s102_s18  ;;  %p108_p5 = scmp.lt.s32.totalorder %s102_s18, %s102_s18 }
   0xc   :  { %p109_p6 = por %p108_p5, %p107_p4 }
   0xe   :  { %p110_p7 = pnand %p109_p6, %p103_p3 }
  0x10   :  { %113 = shalt.err (!%p110_p7)
}
  0x11   :  { %s165_s19 = smov 128   ;;  %s166_s20 = smov 8  }
  0x12   :  { %25 = dma.hbm_to_vmem [thread:$0]  %s220_s0, 256, %s20_s10, [#allocation3], %s165_s19, %s165_s19, %s166_s20  }
  0x13   :  { %s167_s23 = smov [#allocation5]   ;;  %s114_s27 = scalar_lea.hbm %s221_s1, 256 }
  0x14   :  { %s35_s24 = sshll.u32 %s167_s23, 4  ;;  %p115_p8 = scmp.ne.s32.totalorder %s221_s1, %s114_s27  ;;  %s36_s24 = int_to_ptr.vmem [resolvable:$true] %s35_s24 }
  0x15   :  { %p118_p9 = scmp.lt.u32.totalorder %s114_s27, %s221_s1 }
  0x17   :  { %p120_p10 = pnand %p118_p9, %p115_p8 }
  0x19   :  { %123 = shalt.err (!%p120_p10)
}
  0x1a   :  { %s124_s4 = scalar_lea.vmem %s36_s24, 256  ;;  %p129_p12 = scmp.lt.s32.totalorder %s36_s24, %s36_s24 }
  0x1b   :  { %p125_p11 = scmp.ne.s32.totalorder %s36_s24, %s124_s4  ;;  %p130_p13 = scmp.lt.s32.totalorder %s124_s4, %s124_s4 }
  0x1d   :  { %p131_p0 = por %p130_p13, %p129_p12 }
  0x1f   :  { %p132_p1 = pnand %p131_p0, %p125_p11 }
  0x21   :  { %135 = shalt.err (!%p132_p1)
}
  0x22   :  { %41 = dma.hbm_to_vmem [thread:$0]  %s221_s1, 256, %s36_s24, [#allocation6], %s165_s19, %s165_s19, %s166_s20  }
  0x23   :  { %158 = dma.done.wait [#allocation3], 256  }
  0x24   :  { %159 = vsyncadd [#allocation3], 4294967040 }
  0x25   :  { %160 = dma.done.wait [#allocation6], 256  }
  0x26   :  { %161 = vsyncadd [#allocation6], 4294967040  ;;  %v57_v0 = vld [vmem:[#allocation2] sm:$0xff]  ;;  %v58_v1 = vld [vmem:[#allocation2 + $0x8] sm:$0xff]  ;;  %s168_s6 = smov [#allocation7]  }
  0x27   :  { %v59_v2 = vld [vmem:[#allocation5] sm:$0xff]  ;;  %v60_v3 = vld [vmem:[#allocation5 + $0x8] sm:$0xff]  ;;  %s76_s7 = sshll.u32 %s168_s6, 4  ;;  %s77_s7 = int_to_ptr.vmem [resolvable:$true] %s76_s7 }
  0x28   :  { %v61_v4 = vsub.f32 %v57_v0, %v59_v2  ;;  %v62_v5 = vsub.f32 %v58_v1, %v60_v3  ;;  %s136_s8 = scalar_lea.vmem %s77_s7, 128  ;;  %p141_p3 = scmp.lt.s32.totalorder %s77_s7, %s77_s7 }
  0x29   :  { %p137_p2 = scmp.ne.s32.totalorder %s77_s7, %s136_s8  ;;  %p142_p4 = scmp.lt.s32.totalorder %s136_s8, %s136_s8 }
  0x2a   :  { %v63_v6 = vmul.f32 %v61_v4, %v61_v4  ;;  %v64_v7 = vmul.f32 %v62_v5, %v62_v5 }
  0x2b   :  { %p143_p5 = por %p142_p4, %p141_p3 }
  0x2c   :  { %v65_v8 = vadd.f32 %v64_v7, %v63_v6 }
  0x2d   :  { %p144_p6 = pnand %p143_p5, %p137_p2 }
  0x2e   :  { %69 = vst [vmem:[#allocation7] sm:$0xff] %v65_v8 }
  0x2f   :  { %147 = shalt.err (!%p144_p6)
}
  0x30   :  { %s148_s10 = scalar_lea.hbm %s222_s2, 128 }
  0x31   :  { %p149_p7 = scmp.ne.s32.totalorder %s222_s2, %s148_s10  ;;  %p152_p8 = scmp.lt.u32.totalorder %s148_s10, %s222_s2 }
  0x33   :  { %p154_p9 = pnand %p152_p8, %p149_p7 }
  0x35   :  { %157 = shalt.err (!%p154_p9)
}
  0x36   :  { %79 = dma.vmem_to_hbm [thread:$0]  %s77_s7, 128, %s222_s2, [#allocation4]  }
  0x37   :  { %162 = dma.done.wait [#allocation4], 128  }
  0x38   :  { %163 = vsyncadd [#allocation4], 4294967168 }
  0x39   :  { %83 = vsyncpa [#allocation3], 1 }
  0x3a   :  { %84 = vsyncpa [#allocation6], 1 }
  0x3b   :  { %85 = vsyncpa [#allocation4], 1 }

</bundles_post_ra>
